<compile_context>
chip_gen: v7x
topology: tpu7x:2x2x1
jax: 0.10.0
libtpu: 0.0.40
codegen_flags: <defaults>
</compile_context>

<pallas_src>
import functools

import jax
import jax.numpy as jnp
from jax.experimental import pallas as pl
from jax.experimental.pallas import tpu as pltpu


def _fused_gated_mlp_kernel(*refs, relu_flags, compute_dtype):
    """Fused forward for a stack of frozen-gated linears.

    refs = (x_ref, w0_ref, b0_ref, w1_ref, b1_ref, ..., o_ref)
      w_i pre-folded with its gate, pre-transposed to (K_i, N_i), compute_dtype
      b_i pre-folded with its gate, shape (1, N_i), f32
    Intermediate activations stay on-chip (never written back to HBM).
    """
    x_ref, o_ref = refs[0], refs[-1]
    param_refs = refs[1:-1]
    n_layers = len(relu_flags)

    h = x_ref[...]
    for li in range(n_layers):                       # unrolled at trace time
        w = param_refs[2 * li][...]                  # (K, N), native MXU orientation
        b = param_refs[2 * li + 1][...]              # (1, N), f32
        # Cast the MXU operand in-kernel (free vs. DMA); accumulate in f32.
        acc = jnp.dot(h.astype(compute_dtype), w,
                      preferred_element_type=jnp.float32)
        acc = acc + b                                # bias add in f32 (VPU)
        if relu_flags[li]:
            acc = jnp.maximum(acc, 0.0)
        h = acc
    o_ref[...] = h.astype(o_ref.dtype)


def frozen_gated_model_forward(x, params, *, compute_dtype=jnp.float32,
                               tile_m=2048):
    """FrozenGatedModel forward: single fused pallas_call over all layers."""
    out_dtype = x.dtype
    M, K0 = x.shape

    # --- fold frozen gates ONCE (valid: gates are frozen buffers == ones) and
    #     pre-transpose weights to (K, N); weights are tiny, dtype is free ----
    ws, bs, relus = [], [], []
    for layer in params:
        w_eff = (layer["weight"] * layer["weight_gates"]).T.astype(compute_dtype)
        b_eff = (layer["bias"] * layer["bias_gates"]).reshape(1, -1).astype(jnp.float32)
        ws.append(w_eff)
        bs.append(b_eff)
        relus.append(bool(layer["relu_after"]))
    N_out = ws[-1].shape[1]

    # --- batch tile: multiple of 8, big enough to amortize step overhead -----
    tm = min(int(tile_m), ((M + 7) // 8) * 8)
    tm = max(8, (tm // 8) * 8)
    grid = (pl.cdiv(M, tm),)                 # ragged last tile masked by Pallas

    # --- BlockSpecs: x/out tiled over M; weights & biases resident ----------
    in_specs = [pl.BlockSpec((tm, K0), lambda i: (i, 0))]
    operands = [x]                           # no wrapper-side pad/cast passes
    for w_eff, b_eff in zip(ws, bs):
        in_specs.append(pl.BlockSpec(w_eff.shape, lambda i: (0, 0)))
        in_specs.append(pl.BlockSpec(b_eff.shape, lambda i: (0, 0)))
        operands.append(w_eff)
        operands.append(b_eff)

    kernel = functools.partial(
        _fused_gated_mlp_kernel,
        relu_flags=tuple(relus),
        compute_dtype=compute_dtype,
    )

    # VMEM footprint at tm=2048: x tile 2048x32 f32 occupies ~1 MiB in VMEM
    # (32/128 lanes used -> 4x logical), out tile ~1 MiB, double buffered ->
    # ~4 MiB total; well under the 32 MiB scoped default on every generation.
    out = pl.pallas_call(
        kernel,
        out_shape=jax.ShapeDtypeStruct((M, N_out), out_dtype),
        grid=grid,
        in_specs=in_specs,
        out_specs=pl.BlockSpec((tm, N_out), lambda i: (i, 0)),
        compiler_params=pltpu.CompilerParams(
            dimension_semantics=("parallel",),   # batch tiles across v7x's 2 TCs
        ),
    )(*operands)

    return out


def make_params(key, in_dim, hidden_dim, out_dim, dtype=jnp.float32):
    """Parameters mimicking FrozenGatedModel over [Linear, ReLU, Linear]."""
    k1, k2, k3, k4 = jax.random.split(key, 4)
    layer0 = {
        "weight": jax.random.normal(k1, (hidden_dim, in_dim), dtype) * 0.1,
        "weight_gates": jnp.ones((hidden_dim, in_dim), dtype),   # frozen ones
        "bias": jax.random.normal(k2, (hidden_dim,), dtype) * 0.1,
        "bias_gates": jnp.ones((hidden_dim,), dtype),
        "relu_after": True,    # the nn.ReLU of the original sequential, fused
    }
    layer1 = {
        "weight": jax.random.normal(k3, (out_dim, hidden_dim), dtype) * 0.1,
        "weight_gates": jnp.ones((out_dim, hidden_dim), dtype),
        "bias": jax.random.normal(k4, (out_dim,), dtype) * 0.1,
        "bias_gates": jnp.ones((out_dim,), dtype),
        "relu_after": False,
    }
    return [layer0, layer1]


def reference_forward(x, params):
    """Pure-JAX reference matching the PyTorch FrozenGatedLinear semantics."""
    h = x
    for layer in params:
        w = layer["weight"] * layer["weight_gates"]
        b = layer["bias"] * layer["bias_gates"]
        h = h @ w.T + b
        if layer["relu_after"]:
            h = jnp.maximum(h, 0.0)
    return h


if __name__ == "__main__":
    batch, in_dim, hidden_dim, out_dim = 8, 32, 64, 16
    key = jax.random.PRNGKey(0)
    kx, kp = jax.random.split(key)
    x = jax.random.normal(kx, (batch, in_dim), jnp.float32)
    params = make_params(kp, in_dim, hidden_dim, out_dim)

    ref = reference_forward(x, params)

    # f32 compute path (bit-accurate vs. the reference semantics)
    out_f32 = jax.block_until_ready(
        frozen_gated_model_forward(x, params, compute_dtype=jnp.float32))
    assert out_f32.shape == (batch, out_dim)
    assert jnp.allclose(out_f32, ref, atol=1e-5, rtol=1e-5), "f32 mismatch vs reference"

    # bf16 MXU path: x stays f32 in HBM; the cast to bf16 happens in-kernel just
    # before the dot, so only the matmul operands are rounded (f32 accumulate).
    out_bf16 = jax.block_until_ready(
        frozen_gated_model_forward(x, params, compute_dtype=jnp.bfloat16))
    assert out_bf16.shape == (batch, out_dim)
    assert jnp.allclose(out_bf16, ref, atol=2e-2, rtol=2e-2), "bf16 mismatch vs reference"

    # Ragged-grid path: M not a multiple of the tile (exercises masked writeback).
    x_big = jax.random.normal(kx, (1000, in_dim), jnp.float32)
    out_big = jax.block_until_ready(
        frozen_gated_model_forward(x_big, params, compute_dtype=jnp.float32,
                                   tile_m=256))
    assert out_big.shape == (1000, out_dim)
    assert jnp.allclose(out_big, reference_forward(x_big, params),
                        atol=1e-5, rtol=1e-5), "ragged-M mismatch vs reference"

    print("KERNEL_OK")
</pallas_src>

<mosaic_0001>
module attributes {stable_mosaic.version = 11 : i64} {
  func.func @_fused_gated_mlp_kernel(%arg0: i32, %arg1: memref<8x32xf32, #tpu.memory_space<vmem>>, %arg2: memref<32x64xf32, #tpu.memory_space<vmem>>, %arg3: memref<1x64xf32, #tpu.memory_space<vmem>>, %arg4: memref<64x16xf32, #tpu.memory_space<vmem>>, %arg5: memref<1x16xf32, #tpu.memory_space<vmem>>, %arg6: memref<8x16xf32, #tpu.memory_space<vmem>>) attributes {dimension_semantics = [#tpu.dimension_semantics<parallel>], iteration_bounds = array<i64: 1>, scalar_prefetch = 0 : i64, scratch_operands = 0 : i64, tpu.core_type = #tpu.core_type<tc>, window_params = [{transform_indices = @transform_0, window_bounds = array<i64: 8, 32>}, {pipeline_mode = #tpu.pipeline_mode<synchronous>, transform_indices = @transform_1, window_bounds = array<i64: 32, 64>}, {pipeline_mode = #tpu.pipeline_mode<synchronous>, transform_indices = @transform_2, window_bounds = array<i64: 1, 64>}, {pipeline_mode = #tpu.pipeline_mode<synchronous>, transform_indices = @transform_3, window_bounds = array<i64: 64, 16>}, {pipeline_mode = #tpu.pipeline_mode<synchronous>, transform_indices = @transform_4, window_bounds = array<i64: 1, 16>}, {transform_indices = @transform_5, window_bounds = array<i64: 8, 16>}]} {
    %c0 = arith.constant 0 : index
    %c0_0 = arith.constant 0 : index
    %0 = vector.load %arg1[%c0, %c0_0] : memref<8x32xf32, #tpu.memory_space<vmem>>, vector<8x32xf32>
    %c0_1 = arith.constant 0 : index
    %c0_2 = arith.constant 0 : index
    %1 = vector.load %arg2[%c0_1, %c0_2] : memref<32x64xf32, #tpu.memory_space<vmem>>, vector<32x64xf32>
    %c0_3 = arith.constant 0 : index
    %c0_4 = arith.constant 0 : index
    %2 = vector.load %arg3[%c0_3, %c0_4] : memref<1x64xf32, #tpu.memory_space<vmem>>, vector<1x64xf32>
    %cst = arith.constant dense<0.000000e+00> : vector<8x64xf32>
    %3 = tpu.matmul %0, %1, %cst {dimension_numbers = #tpu.dot_dimension_numbers<[1], [0], [0], [1], [0, 0, 1, 1], [], []>} : vector<8x32xf32>, vector<32x64xf32>, vector<8x64xf32> -> vector<8x64xf32>
    %4 = vector.broadcast %2 : vector<1x64xf32> to vector<8x64xf32>
    %5 = arith.addf %3, %4 : vector<8x64xf32>
    %cst_5 = arith.constant 0.000000e+00 : f32
    %6 = vector.broadcast %cst_5 : f32 to vector<8x64xf32>
    %7 = arith.maximumf %5, %6 : vector<8x64xf32>
    %c0_6 = arith.constant 0 : index
    %c0_7 = arith.constant 0 : index
    %8 = vector.load %arg4[%c0_6, %c0_7] : memref<64x16xf32, #tpu.memory_space<vmem>>, vector<64x16xf32>
    %c0_8 = arith.constant 0 : index
    %c0_9 = arith.constant 0 : index
    %9 = vector.load %arg5[%c0_8, %c0_9] : memref<1x16xf32, #tpu.memory_space<vmem>>, vector<1x16xf32>
    %cst_10 = arith.constant dense<0.000000e+00> : vector<8x16xf32>
    %10 = tpu.matmul %7, %8, %cst_10 {dimension_numbers = #tpu.dot_dimension_numbers<[1], [0], [0], [1], [0, 0, 1, 1], [], []>} : vector<8x64xf32>, vector<64x16xf32>, vector<8x16xf32> -> vector<8x16xf32>
    %11 = vector.broadcast %9 : vector<1x16xf32> to vector<8x16xf32>
    %12 = arith.addf %10, %11 : vector<8x16xf32>
    %c0_11 = arith.constant 0 : index
    %c0_12 = arith.constant 0 : index
    %13 = vector.load %arg6[%c0_11, %c0_12] : memref<8x16xf32, #tpu.memory_space<vmem>>, vector<8x16xf32>
    tpu.vector_store %arg6[%c0_11, %c0_12], %12 {strides = array<i32>} : memref<8x16xf32, #tpu.memory_space<vmem>>, vector<8x16xf32>,
    return
  }
  func.func @transform_0(%arg0: i32) -> (i32, i32) {
    %c0_i32 = arith.constant 0 : i32
    %c0_i32_0 = arith.constant 0 : i32
    return %arg0, %c0_i32 : i32, i32
  }
  func.func @transform_1(%arg0: i32) -> (i32, i32) {
    %c0_i32 = arith.constant 0 : i32
    %c0_i32_0 = arith.constant 0 : i32
    %c0_i32_1 = arith.constant 0 : i32
    return %c0_i32, %c0_i32_0 : i32, i32
  }
  func.func @transform_2(%arg0: i32) -> (i32, i32) {
    %c0_i32 = arith.constant 0 : i32
    %c0_i32_0 = arith.constant 0 : i32
    %c0_i32_1 = arith.constant 0 : i32
    return %c0_i32, %c0_i32_0 : i32, i32
  }
  func.func @transform_3(%arg0: i32) -> (i32, i32) {
    %c0_i32 = arith.constant 0 : i32
    %c0_i32_0 = arith.constant 0 : i32
    %c0_i32_1 = arith.constant 0 : i32
    return %c0_i32, %c0_i32_0 : i32, i32
  }
  func.func @transform_4(%arg0: i32) -> (i32, i32) {
    %c0_i32 = arith.constant 0 : i32
    %c0_i32_0 = arith.constant 0 : i32
    %c0_i32_1 = arith.constant 0 : i32
    return %c0_i32, %c0_i32_0 : i32, i32
  }
  func.func @transform_5(%arg0: i32) -> (i32, i32) {
    %c0_i32 = arith.constant 0 : i32
    %c0_i32_0 = arith.constant 0 : i32
    return %arg0, %c0_i32 : i32, i32
  }
}

</mosaic_0001>

<bundles_post_ra>
// kernel: tpu_custom_call.1
= control target key start
LH: loop header
LB: loop body
LE: loop exit
PB: predicated region body
PF: predicated region fallthrough
CT: control target
= control target key end

     0   :  { %v307_v3 = vmov 0.0|0.0   ;;  %vm308_vm0 = vmmov 0   ;;  %v309_v6 = vmov 0.0   ;;  %s398_s0 = inlined_call_operand.vmem [shape: f32[8,32], index: 0, kind: input, shape index: {}]   ;;  %s399_s1 = inlined_call_operand.vmem [shape: f32[32,64], index: 1, kind: input, shape index: {}]   ;;  %s400_s2 = inlined_call_operand.vmem [shape: f32[1,64], index: 2, kind: input, shape index: {}]   ;;  %s401_s3 = inlined_call_operand.vmem [shape: f32[64,16], index: 3, kind: input, shape index: {}]   ;;  %s402_s4 = inlined_call_operand.vmem [shape: f32[1,16], index: 4, kind: input, shape index: {}]   ;;  %s403_s5 = inlined_call_operand.hbm [shape: f32[8,16], index: 5, kind: output, shape index: {}]  }
   0x1   :  { %v22_v0 = vld [vmem:[%s399_s1] sm:$0xff]  ;;  %v23_v1 = vld [vmem:[%s399_s1 + $0x8] sm:$0xff]  ;;  %v24_v2 = vld [vmem:[%s399_s1 + $0x10] sm:$0xff]  ;;  %261 = vmatprep.subr.bf16.mxu0 %v307_v3  ;;  %239 = vmatprep.mubr.msk.f32.mxu0 %vm308_vm0, %v309_v6 }
   0x2   :  { %v262_v4 = vpack.c.bf16 %v23_v1, %v22_v0  ;;  %v25_v5 = vld [vmem:[%s399_s1 + $0x18] sm:$0xff]  ;;  %v108_v7 = vld [vmem:[%s401_s3] sm:$0xff]  ;;  %267 = vmatprep.subr.bf16.mxu1 %v307_v3  ;;  %v109_v8 = vld [vmem:[%s401_s3 + $0x8] sm:$0xff]  ;;  %258 = vmatprep.mubr.msk.f32.mxu1 %vm308_vm0, %v309_v6 }
   0x3   :  { %v110_v9 = vld [vmem:[%s401_s3 + $0x10] sm:$0xff]  ;;  %v111_v10 = vld [vmem:[%s401_s3 + $0x18] sm:$0xff]  ;;  %v265_v11 = vpack.c.bf16 %v25_v5, %v24_v2  ;;  %v268_v12 = vpack.c.bf16 %v109_v8, %v108_v7 }
   0x4   :  { %263 = vmatpush3.bf16.msra.mxu0 %v262_v4 }
   0x5   :  { %264 = vmatprep.subr.bf16.mxu0 %v307_v3 }
   0x6   :  { %10 = vsyncpa [#allocation3], 0  ;;  %269 = vmatpush3.bf16.msra.mxu1 %v268_v12  ;;  %v271_v13 = vpack.c.bf16 %v111_v10, %v110_v9  ;;  %v112_v14 = vld [vmem:[%s401_s3 + $0x20] sm:$0xff]  ;;  %v113_v15 = vld [vmem:[%s401_s3 + $0x28] sm:$0xff]  ;;  %vm33_vm1 = vcmask 261120   ;;  %vm123_vm2 = vcmask 523264  }
   0x7   :  { %270 = vmatprep.subr.bf16.mxu1 %v307_v3  ;;  %v21_v16 = vld [vmem:[%s398_s0] sm:$0xff]  ;;  %v274_v17 = vpack.c.bf16 %v113_v15, %v112_v14  ;;  %v114_v18 = vld [vmem:[%s401_s3 + $0x30] sm:$0xff]  ;;  %v115_v19 = vld [vmem:[%s401_s3 + $0x38] sm:$0xff]  ;;  %s310_s21 = smov [#allocation2]   ;;  %vm197_vm3 = vcmask 130048  }
   0x8   :  { %266 = vmatpush3.bf16.msra.mxu0 %v265_v11  ;;  %v277_v20 = vpack.c.bf16 %v115_v19, %v114_v18  ;;  %v213_v21 = vld [vmem:[%s400_s2] ss:$0 sm:$0xff]  ;;  %s205_s22 = sshll.u32 %s310_s21, 4  ;;  %s206_s22 = int_to_ptr.vmem [resolvable:$true] %s205_s22 }
   0x9   :  { %v215_v26 = vld [vmem:[%s402_s4] ss:$0 sm:$0xff]  ;;  %s283_s3 = scalar_lea.vmem %s206_s22, 128  ;;  %p288_p1 = scmp.lt.s32.totalorder %s206_s22, %s206_s22 }
   0xa   :  { %272 = vmatpush3.bf16.msra.mxu1 %v271_v13  ;;  %p284_p0 = scmp.ne.s32.totalorder %s206_s22, %s283_s3  ;;  %p289_p2 = scmp.lt.s32.totalorder %s283_s3, %s283_s3 }
   0xb   :  { %240 = vmatmul.mubr.msk.f32.vlgmr.msra.gmra.mrb[0].mxu0 %vm33_vm1, %v21_v16  ;;  %273 = vmatprep.subr.bf16.mxu1 %v307_v3 }
   0xc   :  { %p290_p3 = por %p289_p2, %p288_p1 }
   0xe   :  { %275 = vmatpush3.bf16.msra.mxu1 %v274_v17  ;;  %p291_p4 = pnand %p290_p3, %p284_p0 }
   0xf   :  { %276 = vmatprep.subr.bf16.mxu1 %v307_v3 }
  0x12   :  { %278 = vmatpush3.bf16.msra.mxu1 %v277_v20 }
  0xde   :  { %v103_v22 = vpop.f32.mrb[0].mxu0 }
  0xdf   :  { %v104_v23 = vadd.f32 %v213_v21, %v103_v22  ;;  %v241_v24 = vpop.f32.mrb[1].mxu0 }
  0xe1   :  { %v107_v25 = vmax.f32 %v104_v23, 0.0 }
  0xe3   :  { %259 = vmatmul.mubr.msk.f32.vlgmr.msra.gmra.mrb[0].mxu1 %vm123_vm2, %v107_v25 }
 0x1b6   :  { %v193_v27 = vpop.f32.mrb[0].mxu1 }
 0x1b7   :  { %v194_v28 = vadd.f32 %v215_v26, %v193_v27  ;;  %v260_v29 = vpop.f32.mrb[1].mxu1 }
 0x1b9   :  { %198 = vst.msk [vmem:[#allocation2] sm:$0xff] %vm197_vm3, %v194_v28 }
 0x1ba   :  { %294 = shalt.err (!%p291_p4)
}
 0x1bb   :  { %s295_s24 = scalar_lea.hbm %s403_s5, 128 }
 0x1bc   :  { %p296_p5 = scmp.ne.s32.totalorder %s403_s5, %s295_s24  ;;  %p299_p6 = scmp.lt.u32.totalorder %s295_s24, %s403_s5 }
 0x1be   :  { %p301_p7 = pnand %p299_p6, %p296_p5 }
 0x1c0   :  { %304 = shalt.err (!%p301_p7)
}
 0x1c1   :  { %208 = dma.vmem_to_hbm [thread:$0]  %s206_s22, 128, %s403_s5, [#allocation3]  }
 0x1c2   :  { %305 = dma.done.wait [#allocation3], 128  }
 0x1c3   :  { %306 = vsyncadd [#allocation3], 4294967168 }
 0x1c4   :  { %212 = vsyncpa [#allocation3], 1 }

</bundles_post_ra>
